<compile_context>
chip_gen: v7x
topology: tpu7x:2x2x1
jax: 0.10.0
libtpu: 0.0.40
codegen_flags: <defaults>
</compile_context>

<pallas_src>
import jax
import jax.numpy as jnp
from jax.experimental import pallas as pl
from jax.experimental.pallas import tpu as pltpu

_LANES = 128
_ROW_UNIT = 16          # keeps each sin/cos half a multiple of 8 sublanes
_MAX_TILE_ROWS = 2048   # 2048*128*4 B = 1 MiB/tile, 2 MiB double-buffered:
                        # well inside v7x's 32 MiB scoped VMEM (and v5e's 16 MiB)


def _round_up(x, m):
    return ((x + m - 1) // m) * m


def _mix32(x):
    """lowbias32-style 32-bit integer finalizer (uint32, wraps mod 2**32)."""
    x = x ^ (x >> 16)
    x = x * jnp.uint32(0x7FEB352D)
    x = x ^ (x >> 15)
    x = x * jnp.uint32(0x846CA68B)
    x = x ^ (x >> 16)
    return x


def _u24_to_unit_float(bits, open_zero):
    """Top 24 bits of `bits` -> float32 uniform in [0,1) (or (0,1] if open_zero)."""
    top = (bits >> 8).astype(jnp.int32)           # < 2**24, fits int32 exactly
    if open_zero:
        top = top + 1                              # (0, 1]: keeps log() finite
    return top.astype(jnp.float32) * jnp.float32(1.0 / (1 << 24))


def _mock_policy_kernel(seed_ref, out_ref):
    """Fill out_ref (tile_rows, 128) with i.i.d. N(0, 1) samples."""
    tile_rows, lanes = out_ref.shape
    half = tile_rows // 2
    pid = pl.program_id(0)

    # Per-call key, per-tile/per-element counters (tiles get disjoint streams).
    seed = jnp.asarray(seed_ref[0], dtype=jnp.uint32)
    k1 = _mix32(seed ^ jnp.uint32(0x9E3779B9))
    k2 = _mix32(seed ^ jnp.uint32(0x85EBCA6B))

    row = jax.lax.broadcasted_iota(jnp.uint32, (half, lanes), 0)
    lane = jax.lax.broadcasted_iota(jnp.uint32, (half, lanes), 1)
    base = jnp.asarray(pid, dtype=jnp.uint32) * jnp.uint32(half * lanes)
    ctr = base + row * jnp.uint32(lanes) + lane

    bits1 = _mix32(ctr ^ k1)
    bits2 = _mix32(ctr ^ k2)

    u1 = _u24_to_unit_float(bits1, open_zero=True)    # (0, 1]
    u2 = _u24_to_unit_float(bits2, open_zero=False)   # [0, 1)

    # Box-Muller, both outputs used: ~2 transcendentals per generated sample.
    r = jnp.sqrt(-2.0 * jnp.log(u1))
    theta = u2 * jnp.float32(2.0 * jnp.pi)
    out_ref[:half, :] = r * jnp.cos(theta)
    out_ref[half:, :] = r * jnp.sin(theta)


def mock_policy_forward(obs, *, action_dim=2, seed=0):
    """JAX/Pallas equivalent of MockPolicy.forward -> randn(B, action_dim).

    NOTE: counter-based RNG — calling twice with the same `seed` returns the
    same samples; thread a fresh seed per call to mimic torch's advancing
    global RNG state.
    """
    batch = obs.shape[0]
    total = batch * action_dim

    # Lane-dense packing of B*action_dim samples into (rows, 128).
    rows = _round_up(max(pl.cdiv(total, _LANES), 1), _ROW_UNIT)
    tile_rows = min(_MAX_TILE_ROWS, rows)
    rows = _round_up(rows, tile_rows)
    num_tiles = rows // tile_rows

    seed_arr = jnp.asarray([seed], dtype=jnp.int32)

    extra = {}
    if jax.devices()[0].platform == "tpu":
        n_elems = rows * _LANES
        extra["compiler_params"] = pltpu.CompilerParams(
            # Tile axis is embarrassingly parallel (shards across v7x's 2 TCs).
            dimension_semantics=("parallel",),
        )
        extra["cost_estimate"] = pl.CostEstimate(
            flops=12 * n_elems,
            transcendentals=2 * n_elems,
            bytes_accessed=n_elems * 4 + 4,
        )

    flat = pl.pallas_call(
        _mock_policy_kernel,
        out_shape=jax.ShapeDtypeStruct((rows, _LANES), jnp.float32),
        grid=(num_tiles,),
        in_specs=[pl.BlockSpec(memory_space=pltpu.MemorySpace.SMEM)],
        out_specs=pl.BlockSpec((tile_rows, _LANES), lambda i: (i, 0)),
        **extra,
    )(seed_arr)

    return flat.reshape(-1)[:total].reshape(batch, action_dim)


if __name__ == "__main__":
    key = jax.random.PRNGKey(0)

    # Parity with the PyTorch module: dummy_param exists but is never used.
    dummy_param = jnp.zeros((1,), dtype=jnp.float32)

    # Small observation batch; only obs.shape[0] matters (as in the module).
    obs = jax.random.normal(key, (2, 4, 16, 16), dtype=jnp.float32)

    actions = mock_policy_forward(obs, action_dim=2, seed=0)
    actions = jax.block_until_ready(actions)

    assert actions.shape == (obs.shape[0], 2), actions.shape
    assert actions.dtype == jnp.float32
    assert bool(jnp.all(jnp.isfinite(actions)))

    print("KERNEL_OK")
</pallas_src>

<mosaic_0001>
module attributes {stable_mosaic.version = 11 : i64} {
  func.func @_mock_policy_kernel(%arg0: i32, %arg1: memref<1xi32, #tpu.memory_space<smem>>, %arg2: memref<16x128xf32, #tpu.memory_space<vmem>>) attributes {dimension_semantics = [#tpu.dimension_semantics<arbitrary>], iteration_bounds = array<i64: 1>, scalar_prefetch = 0 : i64, scratch_operands = 0 : i64, tpu.core_type = #tpu.core_type<tc>, window_params = [{transform_indices = @transform_0, window_bounds = array<i64: 1>}, {transform_indices = @transform_1, window_bounds = array<i64: 16, 128>}]} {
    %c0 = arith.constant 0 : index
    %0 = memref.load %arg1[%c0] : memref<1xi32, #tpu.memory_space<smem>>
    %c-1640531527_i32 = arith.constant -1640531527 : i32
    %1 = arith.xori %0, %c-1640531527_i32 : i32
    %c16_i32 = arith.constant 16 : i32
    %2 = arith.shrui %1, %c16_i32 : i32
    %3 = arith.xori %1, %2 : i32
    %c2146121005_i32 = arith.constant 2146121005 : i32
    %4 = arith.muli %3, %c2146121005_i32 : i32
    %c15_i32 = arith.constant 15 : i32
    %5 = arith.shrui %4, %c15_i32 : i32
    %6 = arith.xori %4, %5 : i32
    %c-2073254261_i32 = arith.constant -2073254261 : i32
    %7 = arith.muli %6, %c-2073254261_i32 : i32
    %c16_i32_0 = arith.constant 16 : i32
    %8 = arith.shrui %7, %c16_i32_0 : i32
    %9 = arith.xori %7, %8 : i32
    %c-2048144789_i32 = arith.constant -2048144789 : i32
    %10 = arith.xori %0, %c-2048144789_i32 : i32
    %c16_i32_1 = arith.constant 16 : i32
    %11 = arith.shrui %10, %c16_i32_1 : i32
    %12 = arith.xori %10, %11 : i32
    %c2146121005_i32_2 = arith.constant 2146121005 : i32
    %13 = arith.muli %12, %c2146121005_i32_2 : i32
    %c15_i32_3 = arith.constant 15 : i32
    %14 = arith.shrui %13, %c15_i32_3 : i32
    %15 = arith.xori %13, %14 : i32
    %c-2073254261_i32_4 = arith.constant -2073254261 : i32
    %16 = arith.muli %15, %c-2073254261_i32_4 : i32
    %c16_i32_5 = arith.constant 16 : i32
    %17 = arith.shrui %16, %c16_i32_5 : i32
    %18 = arith.xori %16, %17 : i32
    %19 = tpu.iota {dimensions = array<i32: 0>} : vector<8x128xi32>
    %20 = tpu.iota {dimensions = array<i32: 1>} : vector<8x128xi32>
    %c1024_i32 = arith.constant 1024 : i32
    %21 = arith.muli %arg0, %c1024_i32 : i32
    %c128_i32 = arith.constant 128 : i32
    %22 = vector.broadcast %c128_i32 : i32 to vector<8x128xi32>
    %23 = arith.muli %19, %22 : vector<8x128xi32>
    %24 = vector.broadcast %21 : i32 to vector<8x128xi32>
    %25 = arith.addi %24, %23 : vector<8x128xi32>
    %26 = arith.addi %25, %20 : vector<8x128xi32>
    %27 = vector.broadcast %9 : i32 to vector<8x128xi32>
    %28 = arith.xori %26, %27 : vector<8x128xi32>
    %c16_i32_6 = arith.constant 16 : i32
    %29 = vector.broadcast %c16_i32_6 : i32 to vector<8x128xi32>
    %30 = arith.shrui %28, %29 : vector<8x128xi32>
    %31 = arith.xori %28, %30 : vector<8x128xi32>
    %c2146121005_i32_7 = arith.constant 2146121005 : i32
    %32 = vector.broadcast %c2146121005_i32_7 : i32 to vector<8x128xi32>
    %33 = arith.muli %31, %32 : vector<8x128xi32>
    %c15_i32_8 = arith.constant 15 : i32
    %34 = vector.broadcast %c15_i32_8 : i32 to vector<8x128xi32>
    %35 = arith.shrui %33, %34 : vector<8x128xi32>
    %36 = arith.xori %33, %35 : vector<8x128xi32>
    %c-2073254261_i32_9 = arith.constant -2073254261 : i32
    %37 = vector.broadcast %c-2073254261_i32_9 : i32 to vector<8x128xi32>
    %38 = arith.muli %36, %37 : vector<8x128xi32>
    %c16_i32_10 = arith.constant 16 : i32
    %39 = vector.broadcast %c16_i32_10 : i32 to vector<8x128xi32>
    %40 = arith.shrui %38, %39 : vector<8x128xi32>
    %41 = arith.xori %38, %40 : vector<8x128xi32>
    %42 = vector.broadcast %18 : i32 to vector<8x128xi32>
    %43 = arith.xori %26, %42 : vector<8x128xi32>
    %c16_i32_11 = arith.constant 16 : i32
    %44 = vector.broadcast %c16_i32_11 : i32 to vector<8x128xi32>
    %45 = arith.shrui %43, %44 : vector<8x128xi32>
    %46 = arith.xori %43, %45 : vector<8x128xi32>
    %c2146121005_i32_12 = arith.constant 2146121005 : i32
    %47 = vector.broadcast %c2146121005_i32_12 : i32 to vector<8x128xi32>
    %48 = arith.muli %46, %47 : vector<8x128xi32>
    %c15_i32_13 = arith.constant 15 : i32
    %49 = vector.broadcast %c15_i32_13 : i32 to vector<8x128xi32>
    %50 = arith.shrui %48, %49 : vector<8x128xi32>
    %51 = arith.xori %48, %50 : vector<8x128xi32>
    %c-2073254261_i32_14 = arith.constant -2073254261 : i32
    %52 = vector.broadcast %c-2073254261_i32_14 : i32 to vector<8x128xi32>
    %53 = arith.muli %51, %52 : vector<8x128xi32>
    %c16_i32_15 = arith.constant 16 : i32
    %54 = vector.broadcast %c16_i32_15 : i32 to vector<8x128xi32>
    %55 = arith.shrui %53, %54 : vector<8x128xi32>
    %56 = arith.xori %53, %55 : vector<8x128xi32>
    %c8_i32 = arith.constant 8 : i32
    %57 = vector.broadcast %c8_i32 : i32 to vector<8x128xi32>
    %58 = arith.shrui %41, %57 : vector<8x128xi32>
    %c1_i32 = arith.constant 1 : i32
    %59 = vector.broadcast %c1_i32 : i32 to vector<8x128xi32>
    %60 = arith.addi %58, %59 : vector<8x128xi32>
    %61 = arith.sitofp %60 : vector<8x128xi32> to vector<8x128xf32>
    %cst = arith.constant 5.96046448E-8 : f32
    %62 = vector.broadcast %cst : f32 to vector<8x128xf32>
    %63 = arith.mulf %61, %62 : vector<8x128xf32>
    %c8_i32_16 = arith.constant 8 : i32
    %64 = vector.broadcast %c8_i32_16 : i32 to vector<8x128xi32>
    %65 = arith.shrui %56, %64 : vector<8x128xi32>
    %66 = arith.sitofp %65 : vector<8x128xi32> to vector<8x128xf32>
    %cst_17 = arith.constant 5.96046448E-8 : f32
    %67 = vector.broadcast %cst_17 : f32 to vector<8x128xf32>
    %68 = arith.mulf %66, %67 : vector<8x128xf32>
    %69 = math.log %63 : vector<8x128xf32>
    %cst_18 = arith.constant -2.000000e+00 : f32
    %70 = vector.broadcast %cst_18 : f32 to vector<8x128xf32>
    %71 = arith.mulf %70, %69 : vector<8x128xf32>
    %72 = math.sqrt %71 : vector<8x128xf32>
    %cst_19 = arith.constant 6.28318548 : f32
    %73 = vector.broadcast %cst_19 : f32 to vector<8x128xf32>
    %74 = arith.mulf %68, %73 : vector<8x128xf32>
    %75 = math.cos %74 : vector<8x128xf32>
    %76 = arith.mulf %72, %75 : vector<8x128xf32>
    %c0_20 = arith.constant 0 : index
    %c0_21 = arith.constant 0 : index
    %77 = vector.load %arg2[%c0_20, %c0_21] : memref<16x128xf32, #tpu.memory_space<vmem>>, vector<8x128xf32>
    tpu.vector_store %arg2[%c0_20, %c0_21], %76 {strides = array<i32>} : memref<16x128xf32, #tpu.memory_space<vmem>>, vector<8x128xf32>,
    %78 = math.sin %74 : vector<8x128xf32>
    %79 = arith.mulf %72, %78 : vector<8x128xf32>
    %c8 = arith.constant 8 : index
    %c0_22 = arith.constant 0 : index
    %80 = vector.load %arg2[%c8, %c0_22] : memref<16x128xf32, #tpu.memory_space<vmem>>, vector<8x128xf32>
    tpu.vector_store %arg2[%c8, %c0_22], %79 {strides = array<i32>} : memref<16x128xf32, #tpu.memory_space<vmem>>, vector<8x128xf32>,
    return
  }
  func.func @transform_0(%arg0: i32) -> i32 {
    %c0_i32 = arith.constant 0 : i32
    %c0_i32_0 = arith.constant 0 : i32
    return %c0_i32 : i32
  }
  func.func @transform_1(%arg0: i32) -> (i32, i32) {
    %c0_i32 = arith.constant 0 : i32
    %c0_i32_0 = arith.constant 0 : i32
    return %arg0, %c0_i32 : i32, i32
  }
}

</mosaic_0001>

<bundles_post_ra>
// kernel: tpu_custom_call.1
= control target key start
LH: loop header
LB: loop body
LE: loop exit
PB: predicated region body
PF: predicated region fallthrough
CT: control target
= control target key end

     0   :  { %v29_v0 = vlaneseq  ;;  %s415_s0 = inlined_call_operand.<no memory space> [shape: s32[1], index: 0, kind: input, shape index: {}]   ;;  %s416_s1 = inlined_call_operand.hbm [shape: f32[16,128], index: 1, kind: output, shape index: {}]  }
   0x1   :  { %s11_s8 = sxor.u32 2654435769, %s415_s0  ;;  %s20_s11 = sxor.u32 2246822507, %s415_s0 }
   0x2   :  { %s12_s12 = sshrl.u32 %s11_s8, 16  ;;  %s21_s13 = sshrl.u32 %s20_s11, 16  ;;  %v30_v1 = vshrl.u32 %v29_v0, 7 }
   0x3   :  { %s13_s14 = sxor.u32 %s12_s12, %s11_s8  ;;  %s22_s15 = sxor.u32 %s21_s13, %s20_s11 }
   0x4   :  { %s14_s16 = smul.u32 2146121005, %s13_s14 }
   0x5   :  { %7 = vsyncpa [#allocation4], 0  ;;  %s23_s17 = smul.u32 2146121005, %s22_s15  ;;  %v32_v2 = vand.u32 127, %v29_v0  ;;  %v34_v3 = vmul.u32 128, %v30_v1 }
   0x6   :  { %s15_s18 = sshrl.u32 %s14_s16, 15  ;;  %v356_v39 = vmov 683565275   ;;  %v357_v41 = vmov 2475754826   ;;  %s362_s27 = smov [#allocation3]  }
   0x7   :  { %s16_s19 = sxor.u32 %s15_s18, %s14_s16  ;;  %s24_s20 = sshrl.u32 %s23_s17, 15  ;;  %v37_v4 = vadd.s32 %v34_v3, %v32_v2  ;;  %v358_v43 = vmov 2131351028   ;;  %v359_v46 = vmov 2102212464  }
   0x8   :  { %s17_s21 = smul.u32 2221713035, %s16_s19  ;;  %s25_s22 = sxor.u32 %s24_s20, %s23_s17  ;;  %v360_v48 = vmov 920167782   ;;  %v361_v55 = vmov 1326507024  }
   0x9   :  { %s26_s23 = smul.u32 2221713035, %s25_s22  ;;  %s292_s28 = sshll.u32 %s362_s27, 4  ;;  %s293_s28 = int_to_ptr.vmem [resolvable:$true] %s292_s28 }
   0xa   :  { %s18_s25 = sshrl.u32 %s17_s21, 16  ;;  %s332_s29 = scalar_lea.vmem %s293_s28, 256 }
   0xb   :  { %s27_s24 = sshrl.u32 %s26_s23, 16  ;;  %s19_s26 = sxor.u32 %s18_s25, %s17_s21 }
   0xc   :  { %s28_s0 = sxor.u32 %s27_s24, %s26_s23  ;;  %v38_v9 = vstv %s19_s26  ;;  %p333_p0 = scmp.ne.s32.totalorder %s293_s28, %s332_s29 }
   0xd   :  { %v48_v5 = vstv %s28_s0  ;;  %v39_v11 = vxor.u32 %v38_v9, %v37_v4  ;;  %p337_p1 = scmp.lt.s32.totalorder %s293_s28, %s293_s28  ;;  %p338_p2 = scmp.lt.s32.totalorder %s332_s29, %s332_s29 }
   0xe   :  { %v49_v6 = vxor.u32 %v48_v5, %v37_v4 }
   0xf   :  { %v40_v14 = vshrl.u32 %v39_v11, 16  ;;  %p339_p3 = por %p338_p2, %p337_p1 }
  0x10   :  { %v50_v7 = vshrl.u32 %v49_v6, 16 }
  0x11   :  { %v41_v17 = vxor.u32 %v40_v14, %v39_v11  ;;  %p340_p4 = pnand %p339_p3, %p333_p0 }
  0x12   :  { %v51_v8 = vxor.u32 %v50_v7, %v49_v6 }
  0x13   :  { %v42_v20 = vmul.u32 2146121005, %v41_v17 }
  0x14   :  { %v52_v10 = vmul.u32 2146121005, %v51_v8 }
  0x15   :  { %v43_v23 = vshrl.u32 %v42_v20, 15 }
  0x16   :  { %v53_v12 = vshrl.u32 %v52_v10, 15 }
  0x17   :  { %v44_v26 = vxor.u32 %v43_v23, %v42_v20 }
  0x18   :  { %v54_v13 = vxor.u32 %v53_v12, %v52_v10 }
  0x19   :  { %v45_v30 = vmul.u32 2221713035, %v44_v26 }
  0x1a   :  { %v55_v15 = vmul.u32 2221713035, %v54_v13 }
  0x1b   :  { %v46_v34 = vshrl.u32 %v45_v30, 16 }
  0x1c   :  { %v56_v16 = vshrl.u32 %v55_v15, 16 }
  0x1d   :  { %v47_v45 = vxor.u32 %v46_v34, %v45_v30 }
  0x1e   :  { %v57_v18 = vxor.u32 %v56_v16, %v55_v15 }
  0x1f   :  { %v58_v8 = vshrl.u32 %v47_v45, 8 }
  0x20   :  { %v62_v19 = vshrl.u32 %v57_v18, 8 }
  0x21   :  { %v59_v17 = vadd.s32 1, %v58_v8 }
  0x22   :  { %v63_v21 = vcvt.s32.f32 %v62_v19 }
  0x24   :  { %v64_v22 = vmul.f32 5.9604645e-08, %v63_v21  ;;  %v60_v21 = vcvt.s32.f32 %v59_v17 }
  0x26   :  { %v381_v24 = vmul.f32 6.2831855, %v64_v22 }
  0x28   :  { %v79_v25 = vand.u32 2139095040, %v381_v24  ;;  %v76_v28 = vand.u32 2147483647, %v381_v24  ;;  %vm78_vm7 = vcmp.lt.s32.totalorder %v381_v24, 0 }
  0x2a   :  { %v80_v27 = vshrl.u32 %v79_v25, 23  ;;  %v83_v32 = vand.u32 8388607, %v76_v28  ;;  %v61_v25 = vmul.f32 5.9604645e-08, %v60_v21  ;;  %vm77_vm8 = vcmp.le.f32.partialorder %v76_v28, 0.7853982 }
  0x2c   :  { %v303_v29 = vadd.s32 4294967169, %v80_v27  ;;  %v84_v36 = vor.u32 8388608, %v83_v32  ;;  %324 = vlog2.f32 %v61_v25 }
  0x2e   :  { %v86_v31 = vadd.s32 1, %v303_v29  ;;  %v124_v57 = vshll.u32 %v84_v36, 8 }
  0x30   :  { %vm87_vm0 = vcmp.gt.s32.totalorder %v86_v31, 0 }
  0x31   :  { %v88_v33 = vsel %vm87_vm0, %v86_v31, 0 }
  0x32   :  { %v90_v35 = vand.u32 31, %v88_v33  ;;  %v89_v37 = vshrl.u32 %v88_v33, 5 }
  0x34   :  { %v91_v38 = vsub.s32 32, %v90_v35  ;;  %v93_v40 = vshll.u32 %v356_v39, %v90_v35  ;;  %v96_v42 = vshll.u32 %v357_v41, %v90_v35  ;;  %v99_v44 = vshll.u32 %v358_v43, %v90_v35 }
  0x35   :  { %v102_v47 = vshll.u32 %v359_v46, %v90_v35  ;;  %v105_v49 = vshll.u32 %v360_v48, %v90_v35  ;;  %vm108_vm1 = vcmp.lt.s32.totalorder %v89_v37, 1  ;;  %vm111_vm2 = vcmp.lt.s32.totalorder %v89_v37, 4 }
  0x36   :  { %v92_v50 = vshrl.u32 %v356_v39, %v91_v38  ;;  %v94_v51 = vshrl.u32 %v357_v41, %v91_v38  ;;  %v97_v52 = vshrl.u32 %v358_v43, %v91_v38  ;;  %v100_v53 = vshrl.u32 %v359_v46, %v91_v38  ;;  %v325_v34 = vpop.eup %324 }
  0x37   :  { %v103_v54 = vshrl.u32 %v360_v48, %v91_v38  ;;  %v106_v56 = vshrl.u32 %v361_v55, %v91_v38  ;;  %vm109_vm3 = vcmp.lt.s32.totalorder %v89_v37, 2  ;;  %vm110_vm4 = vcmp.lt.s32.totalorder %v89_v37, 3 }
  0x38   :  { %v95_v58 = vor.u32 %v94_v51, %v93_v40  ;;  %v98_v59 = vor.u32 %v97_v52, %v96_v42  ;;  %v101_v60 = vor.u32 %v100_v53, %v99_v44  ;;  %v66_v39 = vmul.f32 0.6931472, %v325_v34 }
  0x39   :  { %v104_v61 = vor.u32 %v103_v54, %v102_v47  ;;  %v107_v62 = vor.u32 %v106_v56, %v105_v49 }
  0x3a   :  { %v112_v63 = vsel %vm108_vm1, %v92_v50, %v95_v58  ;;  %v113_v0 = vsel %vm111_vm2, %v101_v60, 2102212464  ;;  %v116_v1 = vsel %vm108_vm1, %v95_v58, %v98_v59  ;;  %v120_v2 = vsel %vm108_vm1, %v98_v59, %v101_v60 }
  0x3b   :  { %v114_v3 = vsel %vm110_vm4, %v98_v59, %v113_v0  ;;  %v117_v4 = vsel %vm111_vm2, %v104_v61, 920167782  ;;  %v121_v5 = vsel %vm111_vm2, %v107_v62, 1326507024  ;;  %v67_v44 = vmul.f32 -2.0, %v66_v39 }
  0x3c   :  { %v118_v6 = vsel %vm110_vm4, %v101_v60, %v117_v4  ;;  %v122_v7 = vsel %vm110_vm4, %v104_v61, %v121_v5  ;;  %v115_v9 = vsel %vm109_vm3, %v112_v63, %v114_v3  ;;  %vm168_vm1 = vweird.f32 %v381_v24 }
  0x3d   :  { %v119_v10 = vsel %vm109_vm3, %v116_v1, %v118_v6  ;;  %v123_v11 = vsel %vm109_vm3, %v120_v2, %v122_v7  ;;  %v131_v16 = vmul.u32 %v124_v57, %v115_v9  ;;  %326 = vrsqrt.f32 %v67_v44 }
  0x3e   :  { %v387_v12 = vmul.u32.u64.low %v124_v57, %v123_v11  ;;  %v388_v13 = vmul.u32.u64.high %v124_v57, %v123_v11, %v387_v12  ;;  %v390_v14 = vmul.u32.u64.low %v124_v57, %v119_v10  ;;  %v391_v15 = vmul.u32.u64.high %v124_v57, %v119_v10, %v390_v14 }
  0x3f   :  { %vm70_vm9 = vcmp.eq.f32.partialorder %v67_v44, inf  ;;  %vm72_vm10 = vcmp.eq.f32.partialorder %v67_v44, 0.0  ;;  %v73_v61 = vand.u32 2147483648, %v67_v44 }
  0x40   :  { %vm133_vm5 = vc.u32 %v388_v13, %v390_v14  ;;  %v134_v18 = vadd.s32 1, %v391_v15  ;;  %v132_v33 = vadd.s32 %v390_v14, %v388_v13 }
  0x42   :  { %v135_v19 = vsel %vm133_vm5, %v134_v18, %v391_v15 }
  0x43   :  { %v136_v20 = vadd.s32 %v135_v19, %v131_v16 }
  0x45   :  { %v137_v22 = vadd.s32 536870912, %v136_v20 }
  0x47   :  { %v138_v23 = vshrl.u32 %v137_v22, 30  ;;  %v327_v56 = vpop.eup %326 }
  0x48   :  { %v69_v59 = vmul.f32 %v327_v56, %v67_v44 }
  0x49   :  { %v139_v26 = vshll.u32 %v138_v23, 30  ;;  %v162_v48 = vsub.s32 4, %v138_v23 }
  0x4a   :  { %v71_v62 = vsel %vm70_vm9, %v67_v44, %v69_v59 }
  0x4b   :  { %v140_v27 = vsub.s32 %v136_v20, %v139_v26  ;;  %v163_v51 = vsel %vm78_vm7, %v162_v48, %v138_v23  ;;  %v74_v3 = vsel %vm72_vm10, %v73_v61, %v71_v62 }
  0x4c   :  { %v165_v54 = vsel %vm77_vm8, 0, %v163_v51 }
  0x4d   :  { %v142_v29 = vsub.s32 0, %v140_v27  ;;  %v274_v55 = vadd.s32 3, %v165_v54  ;;  %v169_v57 = vand.u32 3, %v165_v54 }
  0x4f   :  { %v304_v30 = vmin.u32 %v142_v29, %v140_v27  ;;  %v275_v58 = vand.u32 3, %v274_v55  ;;  %vm174_vm11 = vcmp.eq.s32.totalorder %v169_v57, 2  ;;  %vm171_vm13 = vcmp.eq.s32.totalorder %v169_v57, 0 }
  0x50   :  { %vm170_vm15 = vcmp.lt.s32.totalorder %v169_v57, 2 }
  0x51   :  { %v144_v31 = vclz %v304_v30  ;;  %vm280_vm12 = vcmp.eq.s32.totalorder %v275_v58, 2  ;;  %vm277_vm14 = vcmp.eq.s32.totalorder %v275_v58, 0  ;;  %vm276_vm0 = vcmp.lt.s32.totalorder %v275_v58, 2 }
  0x53   :  { %v305_v32 = vadd.s32 4294967294, %v144_v31 }
  0x55   :  { %vm306_vm6 = vcmp.lt.s32.totalorder %v305_v32, 0 }
  0x56   :  { %v147_v35 = vsel %vm306_vm6, 0, %v305_v32 }
  0x57   :  { %v148_v36 = vsub.s32 32, %v147_v35  ;;  %v149_v37 = vshll.u32 %v140_v27, %v147_v35  ;;  %v152_v38 = vsub.s32 4294967266, %v147_v35 }
  0x59   :  { %v150_v40 = vshrl.u32 %v132_v33, %v148_v36  ;;  %v153_v41 = vadd.s32 127, %v152_v38 }
  0x5b   :  { %v151_v42 = vor.u32 %v150_v40, %v149_v37  ;;  %v154_v43 = vshll.u32 %v153_v41, 23 }
  0x5d   :  { %v155_v45 = vor.u32 4788187, %v154_v43  ;;  %v158_v46 = vcvt.s32.f32 %v151_v42 }
  0x5f   :  { %v156_v47 = vand.u32 2147483647, %v155_v45 }
  0x61   :  { %v159_v49 = vmul.f32 %v158_v46, %v156_v47 }
  0x63   :  { %v160_v50 = vxor.u32 2147483648, %v159_v49 }
  0x65   :  { %v161_v52 = vsel %vm78_vm7, %v160_v50, %v159_v49 }
  0x66   :  { %v164_v53 = vsel %vm77_vm8, %v381_v24, %v161_v52 }
  0x67   :  { %328 = vcosq.f32 %v164_v53 }
  0x68   :  { %330 = vsinq.f32 %v164_v53 }
  0x71   :  { %v329_v60 = vpop.eup %328 }
  0x72   :  { %v331_v28 = vpop.eup %330  ;;  %v175_v63 = vxor.u32 2147483648, %v329_v60 }
  0x73   :  { %v172_v0 = vxor.u32 2147483648, %v331_v28 }
  0x74   :  { %v176_v1 = vsel %vm174_vm11, %v175_v63, %v331_v28  ;;  %v282_v2 = vsel %vm280_vm12, %v175_v63, %v331_v28 }
  0x75   :  { %v173_v4 = vsel %vm171_vm13, %v329_v60, %v172_v0  ;;  %v279_v5 = vsel %vm277_vm14, %v329_v60, %v172_v0 }
  0x76   :  { %v177_v6 = vsel %vm170_vm15, %v173_v4, %v176_v1  ;;  %v283_v7 = vsel %vm276_vm0, %v279_v5, %v282_v2 }
  0x77   :  { %v178_v8 = vsel %vm168_vm1, nan, %v177_v6  ;;  %v284_v9 = vsel %vm168_vm1, nan, %v283_v7 }
  0x78   :  { %v179_v10 = vmul.f32 %v178_v8, %v74_v3  ;;  %v285_v11 = vmul.f32 %v284_v9, %v74_v3 }
  0x7a   :  { %180 = vst [vmem:[#allocation3] sm:$0xff] %v179_v10  ;;  %286 = vst [vmem:[#allocation3 + $0x8] sm:$0xff] %v285_v11 }
  0x7b   :  { %343 = shalt.err (!%p340_p4)
}
  0x7c   :  { %s344_s3 = scalar_lea.hbm %s416_s1, 256 }
  0x7d   :  { %p345_p5 = scmp.ne.s32.totalorder %s416_s1, %s344_s3  ;;  %p348_p6 = scmp.lt.u32.totalorder %s344_s3, %s416_s1 }
  0x7f   :  { %p350_p7 = pnand %p348_p6, %p345_p5 }
  0x81   :  { %353 = shalt.err (!%p350_p7)
}
  0x82   :  { %s363_s8 = smov 128   ;;  %s364_s9 = smov 8  }
  0x83   :  { %298 = dma.vmem_to_hbm [thread:$0]  %s293_s28, 256, %s416_s1, [#allocation4], %s363_s8, %s363_s8, %s364_s9  }
  0x84   :  { %354 = dma.done.wait [#allocation4], 256  }
  0x85   :  { %355 = vsyncadd [#allocation4], 4294967040 }
  0x86   :  { %302 = vsyncpa [#allocation4], 1 }

</bundles_post_ra>
